<compile_context>
chip_gen: v7x
topology: tpu7x:2x2x1
jax: 0.10.0
libtpu: 0.0.40
codegen_flags: <defaults>
</compile_context>

<pallas_src>
import functools

import jax
import jax.numpy as jnp
from jax.experimental import pallas as pl
from jax.experimental.pallas import tpu as pltpu

_LANES = 128
_MAX_BLOCK_T = 8192   # <= 64 statically-unrolled 128-lane chunks per grid step
_MAX_BLOCK_B = 64     # 3 register accumulators of (block_b, 128) f32 <= 24 vregs


def _cdiv(a, b):
    return -(-a // b)


def _round_up(a, m):
    return _cdiv(a, m) * m


def _sisdr_kernel(pred_ref, gt_ref, out_ref, spp_ref, spg_ref, sgg_ref, *,
                  negative, upper_bound, eps):
    t = pl.program_id(1)

    block_b, block_t = pred_ref.shape
    num_chunks = block_t // _LANES

    # --- register-resident partial sums over this (block_b, block_t) tile ----
    # Deferred cross-lane reduction: fold the tile down to 128 lanes with pure
    # VPU adds; the single XLU lane-reduce + log10 runs once per row at the end.
    acc_pp = jnp.zeros((block_b, _LANES), jnp.float32)
    acc_pg = jnp.zeros((block_b, _LANES), jnp.float32)
    acc_gg = jnp.zeros((block_b, _LANES), jnp.float32)
    for c in range(num_chunks):  # static unroll; lane-aligned static slices
        p = pred_ref[:, c * _LANES:(c + 1) * _LANES].astype(jnp.float32)
        g = gt_ref[:, c * _LANES:(c + 1) * _LANES].astype(jnp.float32)
        acc_pp = acc_pp + p * p
        acc_pg = acc_pg + p * g
        acc_gg = acc_gg + g * g

    # --- one VMEM write (or read-modify-write) per grid step ------------------
    @pl.when(t == 0)
    def _first():
        spp_ref[...] = acc_pp
        spg_ref[...] = acc_pg
        sgg_ref[...] = acc_gg

    @pl.when(t != 0)
    def _rest():
        spp_ref[...] += acc_pp
        spg_ref[...] += acc_pg
        sgg_ref[...] += acc_gg

    # --- finalize: single XLU lane-reduce + scalar math, once per row ---------
    @pl.when(t == pl.num_programs(1) - 1)
    def _finalize():
        s_pp = jnp.sum(spp_ref[...], axis=-1, keepdims=True)   # (block_b, 1)
        s_pg = jnp.sum(spg_ref[...], axis=-1, keepdims=True)
        s_gg = jnp.sum(sgg_ref[...], axis=-1, keepdims=True)

        alpha = (s_pg + eps) / (s_gg + eps)
        a2gg = alpha * alpha * s_gg
        num = a2gg + eps                                        # sum(scaled^2) + eps
        # sum(noise^2) = S_pp - 2*alpha*S_pg + alpha^2*S_gg; clamp against
        # floating-point cancellation when pred ~= alpha*gt.
        den = jnp.maximum(s_pp - 2.0 * alpha * s_pg + a2gg, 0.0) + eps

        si_sdr = 10.0 * jnp.log10(num / den)
        if negative:
            si_sdr = -si_sdr
        if upper_bound is not None:
            si_sdr = jnp.minimum(si_sdr, jnp.float32(upper_bound))
        out_ref[...] = si_sdr.astype(out_ref.dtype)


def _pick_tiles(B, T, sub_align):
    """Default tile selection (both overridable)."""
    # T: multiples of 128, <= _MAX_BLOCK_T lanes, roughly-even split of padded T.
    t_aligned = _round_up(max(T, 1), _LANES)
    n_t = max(1, _cdiv(t_aligned, _MAX_BLOCK_T))
    block_t = _round_up(_cdiv(t_aligned, n_t), _LANES)
    t_pad = block_t * n_t

    # B: multiples of sub_align, <= _MAX_BLOCK_B rows (register accumulators),
    # and >= 2 grid steps when B allows (so the "parallel" batch axis can be
    # sharded across the two v7x TensorCores).
    b_aligned = _round_up(max(B, 1), sub_align)
    n_b = _cdiv(b_aligned, _MAX_BLOCK_B)
    if b_aligned >= 2 * sub_align:
        n_b = max(n_b, 2)
    block_b = _round_up(_cdiv(b_aligned, n_b), sub_align)
    b_pad = block_b * n_b
    return block_b, b_pad, block_t, t_pad


def si_sdr_loss(pred, gt, *, negative=True, upper_bound=None,
                block_b=None, block_t=None):
    """Pallas TPU implementation of the SiSdr module's forward pass.

    pred, gt: (B, T) arrays. Returns (B,) float32 array of (negative,
    optionally clipped) SI-SDR values, matching the PyTorch module defaults.
    """
    assert pred.shape == gt.shape and pred.ndim == 2
    B, T = pred.shape

    # Common floating dtype; accumulate in f32 inside the kernel regardless.
    dtype = jnp.promote_types(pred.dtype, gt.dtype)
    if dtype not in (jnp.float32, jnp.bfloat16, jnp.float16):
        dtype = jnp.float32
    pred = pred.astype(dtype)
    gt = gt.astype(dtype)
    eps = float(jnp.finfo(dtype).eps)               # torchmetrics: eps of input dtype

    itemsize = jnp.dtype(dtype).itemsize
    sub_align = {4: 8, 2: 16, 1: 32}[itemsize]      # (sublane, 128) min tile rule

    if block_b is None or block_t is None:
        def_bb, _, def_bt, _ = _pick_tiles(B, T, sub_align)
        if block_b is None:
            block_b = def_bb
        if block_t is None:
            block_t = def_bt
    assert block_b % sub_align == 0, "block_b must be a multiple of the sublane tile"
    assert block_t % _LANES == 0, "block_t must be a multiple of 128"

    # Zero-pad to tile multiples (exact: padded samples contribute 0 to the sums;
    # padded rows are sliced off the output).
    B_pad = _round_up(B, block_b)
    T_pad = _round_up(T, block_t)
    if B_pad != B or T_pad != T:
        pad = ((0, B_pad - B), (0, T_pad - T))
        pred = jnp.pad(pred, pad)
        gt = jnp.pad(gt, pad)

    kernel = functools.partial(
        _sisdr_kernel, negative=negative, upper_bound=upper_bound, eps=eps
    )

    # Scoped-VMEM budget: two inputs, double-buffered, plus scratch, plus headroom.
    in_bytes = 2 * 2 * block_b * block_t * itemsize
    scratch_bytes = 3 * block_b * _LANES * 4
    vmem_limit = int(min(100 * 2**20,
                         max(24 * 2**20, 1.5 * (in_bytes + scratch_bytes))))

    out2d = pl.pallas_call(
        kernel,
        out_shape=jax.ShapeDtypeStruct((B_pad, 1), jnp.float32),
        grid_spec=pltpu.PrefetchScalarGridSpec(
            num_scalar_prefetch=0,
            # batch axis outer ("parallel", megacore), T reduction axis inner
            # ("arbitrary", accumulated in VMEM scratch across T tiles).
            grid=(B_pad // block_b, T_pad // block_t),
            in_specs=[
                pl.BlockSpec((block_b, block_t), lambda b, t: (b, t)),
                pl.BlockSpec((block_b, block_t), lambda b, t: (b, t)),
            ],
            # Output block fixed across t -> stays resident, written only at
            # the finalize step.
            out_specs=pl.BlockSpec((block_b, 1), lambda b, t: (b, 0)),
            scratch_shapes=[
                pltpu.VMEM((block_b, _LANES), jnp.float32),  # S_pp
                pltpu.VMEM((block_b, _LANES), jnp.float32),  # S_pg
                pltpu.VMEM((block_b, _LANES), jnp.float32),  # S_gg
            ],
        ),
        compiler_params=pltpu.CompilerParams(
            dimension_semantics=("parallel", "arbitrary"),
            vmem_limit_bytes=vmem_limit,
        ),
    )(pred, gt)
    return out2d[:B, 0]


def _reference(pred, gt, *, negative=True, upper_bound=None):
    eps = jnp.finfo(pred.dtype).eps
    alpha = (jnp.sum(pred * gt, -1, keepdims=True) + eps) / (
        jnp.sum(gt * gt, -1, keepdims=True) + eps
    )
    scaled = alpha * gt
    noise = scaled - pred
    val = (jnp.sum(scaled**2, -1) + eps) / (jnp.sum(noise**2, -1) + eps)
    si_sdr = 10.0 * jnp.log10(val)
    if negative:
        si_sdr = -si_sdr
    if upper_bound is not None:
        si_sdr = jnp.minimum(si_sdr, upper_bound)
    return si_sdr


if __name__ == "__main__":
    key = jax.random.PRNGKey(0)
    k1, k2, k3, k4, k5, k6 = jax.random.split(key, 6)

    # 1) Small aligned test (single grid step, default tiles).
    B, T = 8, 512
    pred = jax.random.normal(k1, (B, T), dtype=jnp.float32)
    gt = jax.random.normal(k2, (B, T), dtype=jnp.float32)
    out = jax.block_until_ready(si_sdr_loss(pred, gt))
    ref = _reference(pred, gt)
    assert out.shape == (B,)
    assert jnp.allclose(out, ref, rtol=1e-4, atol=1e-4), (out, ref)

    # 2) Unaligned shapes: exercises the wrapper zero-padding path and the
    #    upper_bound clipping path.
    B2, T2 = 10, 1000
    pred2 = jax.random.normal(k3, (B2, T2), dtype=jnp.float32)
    gt2 = jax.random.normal(k4, (B2, T2), dtype=jnp.float32)
    out2 = jax.block_until_ready(si_sdr_loss(pred2, gt2, upper_bound=5.0))
    ref2 = _reference(pred2, gt2, upper_bound=5.0)
    assert out2.shape == (B2,)
    assert jnp.allclose(out2, ref2, rtol=1e-4, atol=1e-4), (out2, ref2)

    # 3) Multi-tile test: batch blocking + T-axis accumulation across grid steps.
    B3, T3 = 16, 512
    pred3 = jax.random.normal(k5, (B3, T3), dtype=jnp.float32)
    gt3 = jax.random.normal(k6, (B3, T3), dtype=jnp.float32)
    out3 = jax.block_until_ready(
        si_sdr_loss(pred3, gt3, block_b=8, block_t=128)
    )
    ref3 = _reference(pred3, gt3)
    assert out3.shape == (B3,)
    assert jnp.allclose(out3, ref3, rtol=1e-4, atol=1e-4), (out3, ref3)

    print("KERNEL_OK")
</pallas_src>

<mosaic_0001>
module attributes {stable_mosaic.version = 11 : i64} {
  func.func @_sisdr_kernel(%arg0: i32, %arg1: i32, %arg2: memref<8x512xf32, #tpu.memory_space<vmem>>, %arg3: memref<8x512xf32, #tpu.memory_space<vmem>>, %arg4: memref<8x1xf32, #tpu.memory_space<vmem>>, %arg5: memref<8x128xf32, #tpu.memory_space<vmem>>, %arg6: memref<8x128xf32, #tpu.memory_space<vmem>>, %arg7: memref<8x128xf32, #tpu.memory_space<vmem>>) attributes {dimension_semantics = [#tpu.dimension_semantics<parallel>, #tpu.dimension_semantics<arbitrary>], iteration_bounds = array<i64: 1, 1>, scalar_prefetch = 0 : i64, scratch_operands = 3 : i64, tpu.core_type = #tpu.core_type<tc>, window_params = [{transform_indices = @transform_0, window_bounds = array<i64: 8, 512>}, {transform_indices = @transform_1, window_bounds = array<i64: 8, 512>}, {transform_indices = @transform_2, window_bounds = array<i64: 8, 1>}]} {
    %cst = arith.constant 0.000000e+00 : f32
    %0 = vector.broadcast %cst : f32 to vector<8x128xf32>
    %cst_0 = arith.constant 0.000000e+00 : f32
    %1 = vector.broadcast %cst_0 : f32 to vector<8x128xf32>
    %cst_1 = arith.constant 0.000000e+00 : f32
    %2 = vector.broadcast %cst_1 : f32 to vector<8x128xf32>
    %c0 = arith.constant 0 : index
    %c0_2 = arith.constant 0 : index
    %3 = vector.load %arg2[%c0, %c0_2] : memref<8x512xf32, #tpu.memory_space<vmem>>, vector<8x128xf32>
    %c0_3 = arith.constant 0 : index
    %c0_4 = arith.constant 0 : index
    %4 = vector.load %arg3[%c0_3, %c0_4] : memref<8x512xf32, #tpu.memory_space<vmem>>, vector<8x128xf32>
    %5 = arith.mulf %3, %3 : vector<8x128xf32>
    %6 = arith.addf %0, %5 : vector<8x128xf32>
    %7 = arith.mulf %3, %4 : vector<8x128xf32>
    %8 = arith.addf %1, %7 : vector<8x128xf32>
    %9 = arith.mulf %4, %4 : vector<8x128xf32>
    %10 = arith.addf %2, %9 : vector<8x128xf32>
    %c0_5 = arith.constant 0 : index
    %c128 = arith.constant 128 : index
    %11 = vector.load %arg2[%c0_5, %c128] : memref<8x512xf32, #tpu.memory_space<vmem>>, vector<8x128xf32>
    %c0_6 = arith.constant 0 : index
    %c128_7 = arith.constant 128 : index
    %12 = vector.load %arg3[%c0_6, %c128_7] : memref<8x512xf32, #tpu.memory_space<vmem>>, vector<8x128xf32>
    %13 = arith.mulf %11, %11 : vector<8x128xf32>
    %14 = arith.addf %6, %13 : vector<8x128xf32>
    %15 = arith.mulf %11, %12 : vector<8x128xf32>
    %16 = arith.addf %8, %15 : vector<8x128xf32>
    %17 = arith.mulf %12, %12 : vector<8x128xf32>
    %18 = arith.addf %10, %17 : vector<8x128xf32>
    %c0_8 = arith.constant 0 : index
    %c256 = arith.constant 256 : index
    %19 = vector.load %arg2[%c0_8, %c256] : memref<8x512xf32, #tpu.memory_space<vmem>>, vector<8x128xf32>
    %c0_9 = arith.constant 0 : index
    %c256_10 = arith.constant 256 : index
    %20 = vector.load %arg3[%c0_9, %c256_10] : memref<8x512xf32, #tpu.memory_space<vmem>>, vector<8x128xf32>
    %21 = arith.mulf %19, %19 : vector<8x128xf32>
    %22 = arith.addf %14, %21 : vector<8x128xf32>
    %23 = arith.mulf %19, %20 : vector<8x128xf32>
    %24 = arith.addf %16, %23 : vector<8x128xf32>
    %25 = arith.mulf %20, %20 : vector<8x128xf32>
    %26 = arith.addf %18, %25 : vector<8x128xf32>
    %c0_11 = arith.constant 0 : index
    %c384 = arith.constant 384 : index
    %27 = vector.load %arg2[%c0_11, %c384] : memref<8x512xf32, #tpu.memory_space<vmem>>, vector<8x128xf32>
    %c0_12 = arith.constant 0 : index
    %c384_13 = arith.constant 384 : index
    %28 = vector.load %arg3[%c0_12, %c384_13] : memref<8x512xf32, #tpu.memory_space<vmem>>, vector<8x128xf32>
    %29 = arith.mulf %27, %27 : vector<8x128xf32>
    %30 = arith.addf %22, %29 : vector<8x128xf32>
    %31 = arith.mulf %27, %28 : vector<8x128xf32>
    %32 = arith.addf %24, %31 : vector<8x128xf32>
    %33 = arith.mulf %28, %28 : vector<8x128xf32>
    %34 = arith.addf %26, %33 : vector<8x128xf32>
    %c0_i32 = arith.constant 0 : i32
    %35 = arith.cmpi eq, %arg1, %c0_i32 : i32
    %36 = arith.extui %35 : i1 to i32
    %c0_i32_14 = arith.constant 0 : i32
    %37 = arith.cmpi ne, %36, %c0_i32_14 : i32
    scf.if %37 {
      %c0_19 = arith.constant 0 : index
      %c0_20 = arith.constant 0 : index
      %44 = vector.load %arg5[%c0_19, %c0_20] : memref<8x128xf32, #tpu.memory_space<vmem>>, vector<8x128xf32>
      tpu.vector_store %arg5[%c0_19, %c0_20], %30 {strides = array<i32>} : memref<8x128xf32, #tpu.memory_space<vmem>>, vector<8x128xf32>,
      %c0_21 = arith.constant 0 : index
      %c0_22 = arith.constant 0 : index
      %45 = vector.load %arg6[%c0_21, %c0_22] : memref<8x128xf32, #tpu.memory_space<vmem>>, vector<8x128xf32>
      tpu.vector_store %arg6[%c0_21, %c0_22], %32 {strides = array<i32>} : memref<8x128xf32, #tpu.memory_space<vmem>>, vector<8x128xf32>,
      %c0_23 = arith.constant 0 : index
      %c0_24 = arith.constant 0 : index
      %46 = vector.load %arg7[%c0_23, %c0_24] : memref<8x128xf32, #tpu.memory_space<vmem>>, vector<8x128xf32>
      tpu.vector_store %arg7[%c0_23, %c0_24], %34 {strides = array<i32>} : memref<8x128xf32, #tpu.memory_space<vmem>>, vector<8x128xf32>,
    } else {
    }
    %c0_i32_15 = arith.constant 0 : i32
    %38 = arith.cmpi ne, %arg1, %c0_i32_15 : i32
    %39 = arith.extui %38 : i1 to i32
    %c0_i32_16 = arith.constant 0 : i32
    %40 = arith.cmpi ne, %39, %c0_i32_16 : i32
    scf.if %40 {
      %c0_19 = arith.constant 0 : index
      %c0_20 = arith.constant 0 : index
      %44 = vector.load %arg5[%c0_19, %c0_20] : memref<8x128xf32, #tpu.memory_space<vmem>>, vector<8x128xf32>
      %45 = arith.addf %44, %30 : vector<8x128xf32>
      %c0_21 = arith.constant 0 : index
      %c0_22 = arith.constant 0 : index
      %46 = vector.load %arg5[%c0_21, %c0_22] : memref<8x128xf32, #tpu.memory_space<vmem>>, vector<8x128xf32>
      tpu.vector_store %arg5[%c0_21, %c0_22], %45 {strides = array<i32>} : memref<8x128xf32, #tpu.memory_space<vmem>>, vector<8x128xf32>,
      %c0_23 = arith.constant 0 : index
      %c0_24 = arith.constant 0 : index
      %47 = vector.load %arg6[%c0_23, %c0_24] : memref<8x128xf32, #tpu.memory_space<vmem>>, vector<8x128xf32>
      %48 = arith.addf %47, %32 : vector<8x128xf32>
      %c0_25 = arith.constant 0 : index
      %c0_26 = arith.constant 0 : index
      %49 = vector.load %arg6[%c0_25, %c0_26] : memref<8x128xf32, #tpu.memory_space<vmem>>, vector<8x128xf32>
      tpu.vector_store %arg6[%c0_25, %c0_26], %48 {strides = array<i32>} : memref<8x128xf32, #tpu.memory_space<vmem>>, vector<8x128xf32>,
      %c0_27 = arith.constant 0 : index
      %c0_28 = arith.constant 0 : index
      %50 = vector.load %arg7[%c0_27, %c0_28] : memref<8x128xf32, #tpu.memory_space<vmem>>, vector<8x128xf32>
      %51 = arith.addf %50, %34 : vector<8x128xf32>
      %c0_29 = arith.constant 0 : index
      %c0_30 = arith.constant 0 : index
      %52 = vector.load %arg7[%c0_29, %c0_30] : memref<8x128xf32, #tpu.memory_space<vmem>>, vector<8x128xf32>
      tpu.vector_store %arg7[%c0_29, %c0_30], %51 {strides = array<i32>} : memref<8x128xf32, #tpu.memory_space<vmem>>, vector<8x128xf32>,
    } else {
    }
    %c0_i32_17 = arith.constant 0 : i32
    %41 = arith.cmpi eq, %arg1, %c0_i32_17 : i32
    %42 = arith.extui %41 : i1 to i32
    %c0_i32_18 = arith.constant 0 : i32
    %43 = arith.cmpi ne, %42, %c0_i32_18 : i32
    scf.if %43 {
      %c0_19 = arith.constant 0 : index
      %c0_20 = arith.constant 0 : index
      %44 = vector.load %arg5[%c0_19, %c0_20] : memref<8x128xf32, #tpu.memory_space<vmem>>, vector<8x128xf32>
      %cst_21 = arith.constant dense<0.000000e+00> : vector<8xf32>
      %45 = vector.multi_reduction <add>, %44, %cst_21 [1] : vector<8x128xf32> to vector<8xf32>
      %46 = vector.shape_cast %45 : vector<8xf32> to vector<8x1xf32>
      %c0_22 = arith.constant 0 : index
      %c0_23 = arith.constant 0 : index
      %47 = vector.load %arg6[%c0_22, %c0_23] : memref<8x128xf32, #tpu.memory_space<vmem>>, vector<8x128xf32>
      %cst_24 = arith.constant dense<0.000000e+00> : vector<8xf32>
      %48 = vector.multi_reduction <add>, %47, %cst_24 [1] : vector<8x128xf32> to vector<8xf32>
      %49 = vector.shape_cast %48 : vector<8xf32> to vector<8x1xf32>
      %c0_25 = arith.constant 0 : index
      %c0_26 = arith.constant 0 : index
      %50 = vector.load %arg7[%c0_25, %c0_26] : memref<8x128xf32, #tpu.memory_space<vmem>>, vector<8x128xf32>
      %cst_27 = arith.constant dense<0.000000e+00> : vector<8xf32>
      %51 = vector.multi_reduction <add>, %50, %cst_27 [1] : vector<8x128xf32> to vector<8xf32>
      %52 = vector.shape_cast %51 : vector<8xf32> to vector<8x1xf32>
      %cst_28 = arith.constant 1.1920929E-7 : f32
      %53 = vector.broadcast %cst_28 : f32 to vector<8x1xf32>
      %54 = arith.addf %49, %53 : vector<8x1xf32>
      %cst_29 = arith.constant 1.1920929E-7 : f32
      %55 = vector.broadcast %cst_29 : f32 to vector<8x1xf32>
      %56 = arith.addf %52, %55 : vector<8x1xf32>
      %57 = arith.divf %54, %56 : vector<8x1xf32>
      %58 = arith.mulf %57, %57 : vector<8x1xf32>
      %59 = arith.mulf %58, %52 : vector<8x1xf32>
      %cst_30 = arith.constant 1.1920929E-7 : f32
      %60 = vector.broadcast %cst_30 : f32 to vector<8x1xf32>
      %61 = arith.addf %59, %60 : vector<8x1xf32>
      %cst_31 = arith.constant 2.000000e+00 : f32
      %62 = vector.broadcast %cst_31 : f32 to vector<8x1xf32>
      %63 = arith.mulf %62, %57 : vector<8x1xf32>
      %64 = arith.mulf %63, %49 : vector<8x1xf32>
      %65 = arith.subf %46, %64 : vector<8x1xf32>
      %66 = arith.addf %65, %59 : vector<8x1xf32>
      %cst_32 = arith.constant 0.000000e+00 : f32
      %67 = vector.broadcast %cst_32 : f32 to vector<8x1xf32>
      %68 = arith.maximumf %66, %67 : vector<8x1xf32>
      %cst_33 = arith.constant 1.1920929E-7 : f32
      %69 = vector.broadcast %cst_33 : f32 to vector<8x1xf32>
      %70 = arith.addf %68, %69 : vector<8x1xf32>
      %71 = arith.divf %61, %70 : vector<8x1xf32>
      %72 = math.log %71 : vector<8x1xf32>
      %cst_34 = arith.constant 0.434294492 : f32
      %73 = vector.broadcast %cst_34 : f32 to vector<8x1xf32>
      %74 = arith.mulf %72, %73 : vector<8x1xf32>
      %cst_35 = arith.constant 1.000000e+01 : f32
      %75 = vector.broadcast %cst_35 : f32 to vector<8x1xf32>
      %76 = arith.mulf %75, %74 : vector<8x1xf32>
      %cst_36 = arith.constant 0.000000e+00 : f32
      %77 = vector.broadcast %cst_36 : f32 to vector<8x1xf32>
      %78 = arith.subf %77, %76 : vector<8x1xf32>
      %c0_37 = arith.constant 0 : index
      %c0_38 = arith.constant 0 : index
      %79 = vector.load %arg4[%c0_37, %c0_38] : memref<8x1xf32, #tpu.memory_space<vmem>>, vector<8x1xf32>
      tpu.vector_store %arg4[%c0_37, %c0_38], %78 {strides = array<i32>} : memref<8x1xf32, #tpu.memory_space<vmem>>, vector<8x1xf32>,
    } else {
    }
    return
  }
  func.func @transform_0(%arg0: i32, %arg1: i32) -> (i32, i32) {
    %c0_i32 = arith.constant 0 : i32
    return %arg0, %arg1 : i32, i32
  }
  func.func @transform_1(%arg0: i32, %arg1: i32) -> (i32, i32) {
    %c0_i32 = arith.constant 0 : i32
    return %arg0, %arg1 : i32, i32
  }
  func.func @transform_2(%arg0: i32, %arg1: i32) -> (i32, i32) {
    %c0_i32 = arith.constant 0 : i32
    %c0_i32_0 = arith.constant 0 : i32
    return %arg0, %c0_i32 : i32, i32
  }
}

</mosaic_0001>

<bundles_post_ra>
// kernel: tpu_custom_call.1
= control target key start
LH: loop header
LB: loop body
LE: loop exit
PB: predicated region body
PF: predicated region fallthrough
CT: control target
= control target key end

     0   :  { %7 = vsyncpa [#allocation6], 0  ;;  %s227_s0 = inlined_call_operand.hbm [shape: f32[8,512], index: 0, kind: input, shape index: {}]   ;;  %s228_s1 = inlined_call_operand.hbm [shape: f32[8,512], index: 1, kind: input, shape index: {}]   ;;  %s229_s2 = inlined_call_operand.vmem [shape: f32[8,1], index: 2, kind: output, shape index: {}]  }
   0x1   :  { %8 = vsyncpa [#allocation8], 0  ;;  %s183_s9 = smov [#allocation5]   ;;  %s184_s11 = smov [#allocation7]  }
   0x2   :  { %s15_s10 = sshll.u32 %s183_s9, 4  ;;  %s25_s12 = sshll.u32 %s184_s11, 4  ;;  %s16_s10 = int_to_ptr.vmem [resolvable:$true] %s15_s10  ;;  %s26_s12 = int_to_ptr.vmem [resolvable:$true] %s25_s12 }
   0x3   :  { %s135_s15 = scalar_lea.hbm %s227_s0, 512 }
   0x4   :  { %p136_p0 = scmp.ne.s32.totalorder %s227_s0, %s135_s15  ;;  %p139_p1 = scmp.lt.u32.totalorder %s135_s15, %s227_s0 }
   0x6   :  { %p141_p2 = pnand %p139_p1, %p136_p0 }
   0x8   :  { %144 = shalt.err (!%p141_p2)
}
   0x9   :  { %s145_s20 = scalar_lea.vmem %s16_s10, 512  ;;  %p150_p4 = scmp.lt.s32.totalorder %s16_s10, %s16_s10 }
   0xa   :  { %p146_p3 = scmp.ne.s32.totalorder %s16_s10, %s145_s20  ;;  %p151_p5 = scmp.lt.s32.totalorder %s145_s20, %s145_s20 }
   0xc   :  { %p152_p6 = por %p151_p5, %p150_p4 }
   0xe   :  { %p153_p7 = pnand %p152_p6, %p146_p3 }
  0x10   :  { %156 = shalt.err (!%p153_p7)
}
  0x11   :  { %18 = dma.hbm_to_vmem [thread:$0]  %s227_s0, 512, %s16_s10, [#allocation6]  }
  0x12   :  { %s157_s25 = scalar_lea.hbm %s228_s1, 512 }
  0x13   :  { %p158_p8 = scmp.ne.s32.totalorder %s228_s1, %s157_s25  ;;  %p161_p9 = scmp.lt.u32.totalorder %s157_s25, %s228_s1 }
  0x15   :  { %p163_p10 = pnand %p161_p9, %p158_p8 }
  0x17   :  { %166 = shalt.err (!%p163_p10)
}
  0x18   :  { %s167_s30 = scalar_lea.vmem %s26_s12, 512  ;;  %p172_p12 = scmp.lt.s32.totalorder %s26_s12, %s26_s12 }
  0x19   :  { %p168_p11 = scmp.ne.s32.totalorder %s26_s12, %s167_s30  ;;  %p173_p13 = scmp.lt.s32.totalorder %s167_s30, %s167_s30 }
  0x1b   :  { %p174_p0 = por %p173_p13, %p172_p12 }
  0x1d   :  { %p175_p1 = pnand %p174_p0, %p168_p11 }
  0x1f   :  { %178 = shalt.err (!%p175_p1)
}
  0x20   :  { %28 = dma.hbm_to_vmem [thread:$0]  %s228_s1, 512, %s26_s12, [#allocation8]  }
  0x21   :  { %179 = dma.done.wait [#allocation6], 512  }
  0x22   :  { %180 = vsyncadd [#allocation6], 4294966784 }
  0x23   :  { %181 = dma.done.wait [#allocation8], 512  }
  0x24   :  { %182 = vsyncadd [#allocation8], 4294966784  ;;  %v36_v0 = vld [vmem:[#allocation7] sm:$0xff]  ;;  %v44_v1 = vld [vmem:[#allocation7 + $0x8] sm:$0xff]  ;;  %vm119_vm0 = vcmask 7168  }
  0x25   :  { %v52_v2 = vld [vmem:[#allocation7 + $0x10] sm:$0xff]  ;;  %v41_v3 = vmul.f32 %v36_v0, %v36_v0  ;;  %v49_v4 = vmul.f32 %v44_v1, %v44_v1  ;;  %v60_v6 = vld [vmem:[#allocation7 + $0x18] sm:$0xff]  ;;  %v35_v7 = vld [vmem:[#allocation5] sm:$0xff] }
  0x26   :  { %v57_v5 = vmul.f32 %v52_v2, %v52_v2  ;;  %v43_v8 = vld [vmem:[#allocation5 + $0x8] sm:$0xff]  ;;  %v39_v9 = vmul.f32 %v36_v0, %v35_v7  ;;  %v51_v11 = vld [vmem:[#allocation5 + $0x10] sm:$0xff]  ;;  %v59_v12 = vld [vmem:[#allocation5 + $0x18] sm:$0xff]  ;;  %v37_v13 = vmul.f32 %v35_v7, %v35_v7  ;;  %v65_v15 = vmul.f32 %v60_v6, %v60_v6 }
  0x27   :  { %v47_v10 = vmul.f32 %v44_v1, %v43_v8  ;;  %v50_v14 = vadd.f32 %v49_v4, %v41_v3  ;;  %v55_v16 = vmul.f32 %v52_v2, %v51_v11  ;;  %v45_v17 = vmul.f32 %v43_v8, %v43_v8 }
  0x28   :  { %v53_v19 = vmul.f32 %v51_v11, %v51_v11  ;;  %v63_v21 = vmul.f32 %v60_v6, %v59_v12  ;;  %v61_v23 = vmul.f32 %v59_v12, %v59_v12 }
  0x29   :  { %v48_v18 = vadd.f32 %v47_v10, %v39_v9  ;;  %v58_v20 = vadd.f32 %v57_v5, %v50_v14  ;;  %v46_v22 = vadd.f32 %v45_v17, %v37_v13 }
  0x2b   :  { %v56_v24 = vadd.f32 %v55_v16, %v48_v18  ;;  %v66_v25 = vadd.f32 %v65_v15, %v58_v20  ;;  %v54_v26 = vadd.f32 %v53_v19, %v46_v22 }
  0x2d   :  { %97 = vadd.xlane.f32.xlu0 %v66_v25  ;;  %v64_v27 = vadd.f32 %v63_v21, %v56_v24  ;;  %v62_v28 = vadd.f32 %v61_v23, %v54_v26 }
  0x2f   :  { %91 = vadd.xlane.f32.xlu1 %v62_v28 }
  0x31   :  { %94 = vadd.xlane.f32.xlu0 %v64_v27 }
  0xba   :  { %v98_v29 = vpop.xlane.xlu0 %97 }
  0xbb   :  { %v100_v30 = vadd.f32 1.1920929e-07, %v98_v29 }
  0xbc   :  { %v92_v37 = vpop.xlane.xlu1 %91 }
  0xbd   :  { %129 = vrcp.f32 %v100_v30 }
  0xbe   :  { %v95_v31 = vpop.xlane.xlu0 %94 }
  0xbf   :  { %v99_v32 = vadd.f32 1.1920929e-07, %v95_v31 }
  0xc7   :  { %v130_v33 = vpop.eup %129 }
  0xc8   :  { %v102_v34 = vmul.f32 %v130_v33, %v99_v32 }
  0xca   :  { %v103_v35 = vmul.f32 %v102_v34, %v102_v34  ;;  %v106_v36 = vmul.f32 2.0, %v102_v34 }
  0xcc   :  { %v107_v38 = vmul.f32 %v106_v36, %v95_v31  ;;  %v104_v39 = vmul.f32 %v103_v35, %v98_v29 }
  0xce   :  { %v108_v40 = vsub.f32 %v92_v37, %v107_v38  ;;  %v105_v44 = vadd.f32 1.1920929e-07, %v104_v39 }
  0xd0   :  { %v109_v41 = vadd.f32 %v108_v40, %v104_v39 }
  0xd2   :  { %v110_v42 = vmax.f32 %v109_v41, 0.0 }
  0xd4   :  { %v111_v43 = vadd.f32 1.1920929e-07, %v110_v42 }
  0xd6   :  { %131 = vrcp.f32 %v111_v43 }
  0xe0   :  { %v132_v45 = vpop.eup %131 }
  0xe1   :  { %v113_v46 = vmul.f32 %v132_v45, %v105_v44 }
  0xe3   :  { %133 = vlog2.f32 %v113_v46 }
  0xed   :  { %v134_v47 = vpop.eup %133 }
  0xee   :  { %v115_v48 = vmul.f32 0.6931472, %v134_v47 }
  0xf0   :  { %v116_v49 = vmul.f32 0.4342945, %v115_v48 }
  0xf2   :  { %v117_v50 = vmul.f32 10.0, %v116_v49 }
  0xf4   :  { %v118_v51 = vsub.f32 0.0, %v117_v50 }
  0xf6   :  { %120 = vst.msk [vmem:[%s229_s2] sm:$0xff] %vm119_vm0, %v118_v51 }
  0xf7   :  { %125 = vsyncpa [#allocation6], 1 }
  0xf8   :  { %126 = vsyncpa [#allocation8], 1 }

</bundles_post_ra>
